<compile_context>
chip_gen: v7x
topology: tpu7x:2x2x1
jax: 0.10.0
libtpu: 0.0.40
codegen_flags: <defaults>
</compile_context>

<pallas_src>
import math
from functools import partial

import jax
import jax.numpy as jnp
from jax import lax
from jax.experimental import pallas as pl
from jax.experimental.pallas import tpu as pltpu

BN_EPS = 1e-5
POOL_SCALES = (1, 2, 3, 6)
VMEM_LIMIT = 32 * 1024 * 1024      # conservative cap that fits v5e/v6e/v7x


def _round_up(v, m):
    return ((v + m - 1) // m) * m


def _pick_tile(dim, candidates):
    for c in candidates:
        if c <= dim and dim % c == 0:
            return c
    return dim


# ----------------------------- Pallas kernels -----------------------------

def _mm_bias_kernel_single(x_ref, w_ref, b_ref, o_ref, *, act):
    """One K block: y = act(x @ w + bias)."""
    y = jnp.dot(x_ref[...], w_ref[...],
                preferred_element_type=jnp.float32) + b_ref[...]
    if act:
        y = jnp.maximum(y, 0.0)
    o_ref[...] = y.astype(o_ref.dtype)


def _mm_bias_kernel_acc(x_ref, w_ref, b_ref, o_ref, acc_ref, *, act):
    """acc += x @ w over the K grid axis; epilogue on the last K step."""
    @pl.when(pl.program_id(1) == 0)
    def _():
        acc_ref[...] = jnp.zeros_like(acc_ref)

    acc_ref[...] += jnp.dot(x_ref[...], w_ref[...],
                            preferred_element_type=jnp.float32)

    @pl.when(pl.program_id(1) == pl.num_programs(1) - 1)
    def _():
        y = acc_ref[...] + b_ref[...]
        if act:
            y = jnp.maximum(y, 0.0)
        o_ref[...] = y.astype(o_ref.dtype)


def fused_matmul(x, w, bias, act, out_dtype=jnp.bfloat16):
    """y = act(x @ w + bias).

    x: (M, K) bf16, w: (K, N) bf16, bias: (1, N) f32.  Output is (M, Np) with
    Np = round_up(N, 128) so stores are lane-dense; callers slice [:, :N].
    f32 accumulation, bf16 MXU inputs.
    """
    M, K = x.shape
    Kw, N = w.shape
    assert Kw == K
    Np = _round_up(N, 128)
    if Np != N:                      # pad only the (small) weight/bias, not x
        w = jnp.pad(w, ((0, 0), (0, Np - N)))
        bias = jnp.pad(bias, ((0, 0), (0, Np - N)))

    # K tiling: single block when small; otherwise a 128-multiple divisor of K
    # (no HBM pad of the big im2col matrix); zero-pad K only as a last resort.
    if K <= 2048:
        tk = K
    else:
        tk = next((c for c in (2048, 1536, 1024, 768, 512, 384, 256, 128)
                   if K % c == 0), None)
        if tk is None:
            Kp = _round_up(K, 512)
            x = jnp.pad(x, ((0, 0), (0, Kp - K)))
            w = jnp.pad(w, ((0, Kp - K), (0, 0)))
            K, tk = Kp, 512
    nk = K // tk

    # M tiling keeps VMEM bounded at real resolutions and gives a parallel
    # axis for megacore / v7x dual-TC sharding.
    tm = M if M <= 512 else _pick_tile(M, (512, 384, 256, 128, 64, 32, 16, 8))
    nm = M // tm

    if nk == 1:
        return pl.pallas_call(
            partial(_mm_bias_kernel_single, act=act),
            out_shape=jax.ShapeDtypeStruct((M, Np), out_dtype),
            grid=(nm,),
            in_specs=[
                pl.BlockSpec((tm, K), lambda m: (m, 0)),
                pl.BlockSpec((K, Np), lambda m: (0, 0)),
                pl.BlockSpec((1, Np), lambda m: (0, 0)),
            ],
            out_specs=pl.BlockSpec((tm, Np), lambda m: (m, 0)),
            compiler_params=pltpu.CompilerParams(
                dimension_semantics=("parallel",),
                vmem_limit_bytes=VMEM_LIMIT),
        )(x, w, bias)

    return pl.pallas_call(
        partial(_mm_bias_kernel_acc, act=act),
        out_shape=jax.ShapeDtypeStruct((M, Np), out_dtype),
        grid=(nm, nk),
        in_specs=[
            pl.BlockSpec((tm, tk), lambda m, k: (m, k)),
            pl.BlockSpec((tk, Np), lambda m, k: (k, 0)),
            pl.BlockSpec((1, Np), lambda m, k: (0, 0)),
        ],
        out_specs=pl.BlockSpec((tm, Np), lambda m, k: (m, 0)),
        scratch_shapes=[pltpu.VMEM((tm, Np), jnp.float32)],
        compiler_params=pltpu.CompilerParams(
            dimension_semantics=("parallel", "arbitrary"),
            vmem_limit_bytes=VMEM_LIMIT),
    )(x, w, bias)


def _spatial_gather_kernel(p_ref, f_ref, o_ref):
    # p: (1, K, HW) class logits; f: (1, HW, C) bf16 features
    logits = p_ref[0].astype(jnp.float32)
    m = jnp.max(logits, axis=-1, keepdims=True)
    e = jnp.exp(logits - m)
    probs = e * pl.reciprocal(jnp.sum(e, axis=-1, keepdims=True), approx=True)
    ctx = jnp.dot(probs.astype(jnp.bfloat16), f_ref[0],
                  preferred_element_type=jnp.float32)
    o_ref[0] = ctx.astype(o_ref.dtype)


def spatial_gather(probs, feats):
    """softmax(probs over HW) @ feats, per batch.  probs (B,K,HW), feats (B,HW,C)."""
    B, K, HW = probs.shape
    _, _, C = feats.shape
    return pl.pallas_call(
        _spatial_gather_kernel,
        out_shape=jax.ShapeDtypeStruct((B, K, C), jnp.bfloat16),
        grid=(B,),
        in_specs=[
            pl.BlockSpec((1, K, HW), lambda b: (b, 0, 0)),
            pl.BlockSpec((1, HW, C), lambda b: (b, 0, 0)),
        ],
        out_specs=pl.BlockSpec((1, K, C), lambda b: (b, 0, 0)),
        compiler_params=pltpu.CompilerParams(
            dimension_semantics=("parallel",),
            vmem_limit_bytes=VMEM_LIMIT),
    )(probs, feats)


def _ocr_fused_kernel(feats_ref, ctx_ref,
                      wp0, bp0, wp1, bp1, wo0, bo0, wo1, bo1,
                      wd, bd, wu, bu, wb1, wb2, bb, o_ref):
    """Fused ObjectAttentionBlock2D + SpatialOCR bottleneck for one HW tile."""
    f32 = jnp.float32
    bf16 = jnp.bfloat16
    x = feats_ref[0]                       # (HWt, Cm) bf16
    c = ctx_ref[0]                         # (K, Cm)  bf16

    def lin(a, w_ref, b_ref):              # ConvBnRelu 1x1 (BN folded into w)
        y = jnp.dot(a, w_ref[...], preferred_element_type=f32) + b_ref[...]
        return jnp.maximum(y, 0.0)

    # f_pixel (attention scale Ck**-0.5 is folded into wp1/bp1 at init)
    q = lin(lin(x, wp0, bp0).astype(bf16), wp1, bp1)        # (HWt, Ck) f32
    # f_object / f_down on the (tiny) object context
    kk = lin(lin(c, wo0, bo0).astype(bf16), wo1, bo1)       # (K, Ck)  f32
    vv = lin(c, wd, bd)                                     # (K, Ck)  f32

    # sim = q @ kk^T, softmax over the K object regions
    sim = lax.dot_general(q.astype(bf16), kk.astype(bf16),
                          dimension_numbers=(((1,), (1,)), ((), ())),
                          preferred_element_type=f32)       # (HWt, K)
    m = jnp.max(sim, axis=-1, keepdims=True)
    e = jnp.exp(sim - m)
    p = e * pl.reciprocal(jnp.sum(e, axis=-1, keepdims=True), approx=True)

    ctx_pix = jnp.dot(p, vv, preferred_element_type=f32)    # (HWt, Ck)
    up = lin(ctx_pix.astype(bf16), wu, bu)                  # (HWt, Cm) f32

    # bottleneck ConvBnRelu on cat([context, feats]) with split weights;
    # output channels are zero-padded to a 128-lane multiple (dense stores).
    out = (jnp.dot(up.astype(bf16), wb1[...], preferred_element_type=f32)
           + jnp.dot(x, wb2[...], preferred_element_type=f32)
           + bb[...])
    o_ref[0] = jnp.maximum(out, 0.0).astype(o_ref.dtype)


def ocr_object_attention(feats, context, params):
    """feats (B,HW,Cm) bf16, context (B,K,Cm) bf16 -> (B,HW,Cmp) bf16."""
    B, HW, Cm = feats.shape
    _, K, _ = context.shape
    Cmp = params["wb1"].shape[1]
    HWt = HW if HW <= 512 else _pick_tile(HW, (512, 256, 128, 64, 32, 16, 8))
    n_hw = HW // HWt

    weights = [params["f_pixel0"]["w"], params["f_pixel0"]["bias"],
               params["f_pixel1"]["w"], params["f_pixel1"]["bias"],
               params["f_object0"]["w"], params["f_object0"]["bias"],
               params["f_object1"]["w"], params["f_object1"]["bias"],
               params["f_down"]["w"], params["f_down"]["bias"],
               params["f_up"]["w"], params["f_up"]["bias"],
               params["wb1"], params["wb2"], params["bb"]]

    def full_spec(arr):
        return pl.BlockSpec(arr.shape, lambda b, t: (0, 0))

    return pl.pallas_call(
        _ocr_fused_kernel,
        out_shape=jax.ShapeDtypeStruct((B, HW, Cmp), jnp.bfloat16),
        grid=(B, n_hw),
        in_specs=[pl.BlockSpec((1, HWt, Cm), lambda b, t: (b, t, 0)),
                  pl.BlockSpec((1, K, Cm), lambda b, t: (b, 0, 0))]
                 + [full_spec(wt) for wt in weights],
        out_specs=pl.BlockSpec((1, HWt, Cmp), lambda b, t: (b, t, 0)),
        compiler_params=pltpu.CompilerParams(
            dimension_semantics=("parallel", "parallel"),
            vmem_limit_bytes=VMEM_LIMIT),
    )(feats, context, *weights)


# ------------------------------ JAX glue ops -------------------------------
# TODO(synk): bilinear resize / adaptive avg-pool are gather/pool patterns with
# no clean rectangular BlockSpec; they remain XLA glue (cheap vs. the convs).

def resize_bilinear(x, out_h, out_w):
    """F.interpolate(mode='bilinear', align_corners=False) for NHWC."""
    B, H, W, C = x.shape
    if (H, W) == (out_h, out_w):
        return x
    dtype = x.dtype
    xf = x.astype(jnp.float32)

    def coords(in_size, out_size):
        s = in_size / out_size
        src = jnp.maximum(
            (jnp.arange(out_size, dtype=jnp.float32) + 0.5) * s - 0.5, 0.0)
        i0 = jnp.minimum(jnp.floor(src).astype(jnp.int32), in_size - 1)
        i1 = jnp.minimum(i0 + 1, in_size - 1)
        w1 = src - i0.astype(jnp.float32)
        return i0, i1, 1.0 - w1, w1

    y0, y1, wy0, wy1 = coords(H, out_h)
    x0, x1, wx0, wx1 = coords(W, out_w)
    a = xf[:, y0][:, :, x0]
    b = xf[:, y0][:, :, x1]
    c = xf[:, y1][:, :, x0]
    d = xf[:, y1][:, :, x1]
    wx0 = wx0[None, None, :, None]
    wx1 = wx1[None, None, :, None]
    top = a * wx0 + b * wx1
    bot = c * wx0 + d * wx1
    out = top * wy0[None, :, None, None] + bot * wy1[None, :, None, None]
    return out.astype(dtype)


def adaptive_avg_pool(x, out_size):
    """nn.AdaptiveAvgPool2d(out_size) for NHWC tensors (PyTorch bin formula)."""
    B, H, W, C = x.shape
    xf = x.astype(jnp.float32)
    rows = []
    for i in range(out_size):
        h0 = (i * H) // out_size
        h1 = -((-(i + 1) * H) // out_size)
        cols = []
        for j in range(out_size):
            w0 = (j * W) // out_size
            w1 = -((-(j + 1) * W) // out_size)
            cols.append(jnp.mean(xf[:, h0:h1, w0:w1, :], axis=(1, 2)))
        rows.append(jnp.stack(cols, axis=1))
    return jnp.stack(rows, axis=1).astype(x.dtype)


def _im2col_3x3(x):
    B, H, W, C = x.shape
    xp = jnp.pad(x, ((0, 0), (1, 1), (1, 1), (0, 0)))
    cols = [xp[:, i:i + H, j:j + W, :] for i in range(3) for j in range(3)]
    return jnp.concatenate(cols, axis=-1).reshape(B * H * W, 9 * C)


def conv_layer(x, p, ksize, act, out_dtype=jnp.bfloat16):
    """1x1 or 3x3 (pad=1, stride=1) conv as a Pallas fused matmul."""
    B, H, W, C = x.shape
    xb = x.astype(jnp.bfloat16)
    xm = _im2col_3x3(xb) if ksize == 3 else xb.reshape(B * H * W, C)
    n_out = p["w"].shape[1]
    y = fused_matmul(xm, p["w"], p["bias"], act, out_dtype=out_dtype)
    return y[:, :n_out].reshape(B, H, W, n_out)


# ------------------------------- parameters --------------------------------

def fold_conv_bn(w, b, gamma, beta, mean, var, eps=BN_EPS):
    """Fold eval-mode BatchNorm into a (fan_in, cout) matmul weight + bias."""
    scale = gamma * lax.rsqrt(var + eps)
    return w * scale[None, :], (b - mean) * scale + beta


def _make_conv(key, cin, cout, k, bn=True):
    # kaiming_uniform_(mode='fan_in', nonlinearity='relu') -> U(-sqrt(6/fan_in), +)
    fan_in = cin * k * k
    bound = math.sqrt(6.0 / fan_in)
    w = jax.random.uniform(key, (fan_in, cout), jnp.float32, -bound, bound)
    b = jnp.zeros((cout,), jnp.float32)          # conv bias init'd to 0
    if bn:
        gamma = jnp.ones((cout,), jnp.float32)
        beta = jnp.zeros((cout,), jnp.float32)
        mean = jnp.zeros((cout,), jnp.float32)
        var = jnp.ones((cout,), jnp.float32)
        w, b = fold_conv_bn(w, b, gamma, beta, mean, var)
    return {"w": w.astype(jnp.bfloat16), "bias": b.reshape(1, cout)}


def init_params(key, num_classes, encoder_channels, fpn_dim=256,
                ocr_mid=64, ocr_key=64):
    *enc, ch_last = encoder_channels
    keys = iter(jax.random.split(key, 64))
    p = {}
    p["ppm_conv"] = [_make_conv(next(keys), ch_last, 512, 1) for _ in POOL_SCALES]
    p["ppm_last_conv"] = _make_conv(next(keys),
                                    ch_last + len(POOL_SCALES) * 512, fpn_dim, 3)
    p["fpn_in"] = [_make_conv(next(keys), c, fpn_dim, 1) for c in enc[::-1]]
    p["fpn_out"] = [_make_conv(next(keys), fpn_dim, fpn_dim, 3) for _ in enc]
    p["conv_last_0"] = _make_conv(next(keys), (len(enc) + 1) * fpn_dim, fpn_dim, 3)
    p["conv_last_1"] = _make_conv(next(keys), fpn_dim, num_classes, 1, bn=False)
    fused_ch = fpn_dim * len(encoder_channels)
    p["conv3x3_ocr"] = _make_conv(next(keys), fused_ch, ocr_mid, 3)

    # ObjectAttentionBlock2D (all 1x1 ConvBnRelu, BN folded)
    p["f_pixel0"] = _make_conv(next(keys), ocr_mid, ocr_key, 1)
    p["f_pixel1"] = _make_conv(next(keys), ocr_key, ocr_key, 1)
    # Fold the attention scale key_channels**-0.5 into f_pixel1 (ReLU commutes
    # with positive scaling), so the kernel does not multiply the sim matrix.
    att = float(ocr_key) ** -0.5
    p["f_pixel1"]["w"] = (p["f_pixel1"]["w"].astype(jnp.float32) * att
                          ).astype(jnp.bfloat16)
    p["f_pixel1"]["bias"] = p["f_pixel1"]["bias"] * att
    p["f_object0"] = _make_conv(next(keys), ocr_mid, ocr_key, 1)
    p["f_object1"] = _make_conv(next(keys), ocr_key, ocr_key, 1)
    p["f_down"] = _make_conv(next(keys), ocr_mid, ocr_key, 1)
    p["f_up"] = _make_conv(next(keys), ocr_key, ocr_mid, 1)

    # SpatialOCR bottleneck on cat([context, feats]): split weight, pad output
    # channels to a 128-lane multiple (dense stores from the fused OCR kernel).
    cmp_ = _round_up(ocr_mid, 128)
    bott = _make_conv(next(keys), 2 * ocr_mid, ocr_mid, 1)
    p["wb1"] = jnp.pad(bott["w"][:ocr_mid], ((0, 0), (0, cmp_ - ocr_mid)))
    p["wb2"] = jnp.pad(bott["w"][ocr_mid:], ((0, 0), (0, cmp_ - ocr_mid)))
    p["bb"] = jnp.pad(bott["bias"], ((0, 0), (0, cmp_ - ocr_mid)))

    lr = _make_conv(next(keys), ocr_mid, ocr_mid // 16, 1)
    lr["w"] = jnp.pad(lr["w"], ((0, cmp_ - ocr_mid), (0, 0)))  # accept padded input
    p["last_reduction"] = lr
    p["cls_head"] = _make_conv(next(keys), ocr_mid // 16, num_classes, 1, bn=False)
    # aux_head exists in the module but is unused in the eval forward().
    return p


# --------------------------------- forward ---------------------------------

def upernet_ocr_forward(features_nchw, params):
    # NCHW -> NHWC, bf16 activations end-to-end (f32 accumulation in kernels).
    feats_nhwc = [jnp.transpose(f, (0, 2, 3, 1)).astype(jnp.bfloat16)
                  for f in features_nchw]
    input_image, *mid_feats, feat_last = feats_nhwc
    B, h, w, _ = feat_last.shape

    # ---- PPM ----
    ppm_out = [feat_last]
    for scale, pconv in zip(POOL_SCALES, params["ppm_conv"]):
        pooled = adaptive_avg_pool(feat_last, scale)
        up = resize_bilinear(pooled, h, w)
        ppm_out.append(conv_layer(up, pconv, 1, act=True))
    f = conv_layer(jnp.concatenate(ppm_out, axis=-1),
                   params["ppm_last_conv"], 3, act=True)

    # ---- FPN top-down ----
    fpn_feature_list = [f]
    for i, feat in enumerate(mid_feats[::-1]):
        feat_x = conv_layer(feat, params["fpn_in"][i], 1, act=True)
        f = feat_x + resize_bilinear(f, feat_x.shape[1], feat_x.shape[2])
        fpn_feature_list.append(conv_layer(f, params["fpn_out"][i], 3, act=True))
    fpn_feature_list.reverse()
    oh, ow = fpn_feature_list[0].shape[1:3]
    fusion = jnp.concatenate(
        [fpn_feature_list[0]]
        + [resize_bilinear(t, oh, ow) for t in fpn_feature_list[1:]], axis=-1)

    # ---- aux logits (conv_last) and OCR stem ----
    out_aux = conv_layer(fusion, params["conv_last_0"], 3, act=True)
    out_aux = conv_layer(out_aux, params["conv_last_1"], 1, act=False)
    feats_ocr = conv_layer(fusion, params["conv3x3_ocr"], 3, act=True)

    Bn, Hh, Ww, Cm = feats_ocr.shape
    K = out_aux.shape[-1]
    HW = Hh * Ww
    feats_flat = feats_ocr.reshape(Bn, HW, Cm)

    # ---- SpatialGather_Module ----
    probs = jnp.transpose(out_aux.reshape(Bn, HW, K), (0, 2, 1))   # (B, K, HW)
    context = spatial_gather(probs, feats_flat)                    # (B, K, Cm)

    # ---- SpatialOCR / ObjectAttentionBlock2D (single fused kernel) ----
    ocr_out = ocr_object_attention(feats_flat, context, params)    # (B, HW, 128)
    # Dropout2d(0.05) is identity at inference.

    # ---- heads ----
    lr = params["last_reduction"]
    cred = lr["w"].shape[1]
    red = fused_matmul(ocr_out.reshape(Bn * HW, ocr_out.shape[-1]),
                       lr["w"], lr["bias"], act=True)
    red = red[:, :cred].reshape(Bn, Hh, Ww, cred)
    red = resize_bilinear(red, input_image.shape[1], input_image.shape[2])
    out = conv_layer(red, params["cls_head"], 1, act=False,
                     out_dtype=jnp.float32)

    # eval-mode forward: only `out` is returned (out_aux only in training).
    if out.shape[-1] == 1:
        return out[..., 0]                     # (B, H, W) when num_classes == 1
    return jnp.transpose(out, (0, 3, 1, 2))    # back to NCHW


# ----------------------------------- main -----------------------------------

if __name__ == "__main__":
    key = jax.random.PRNGKey(0)
    k_in, k_p = jax.random.split(key)
    ks = jax.random.split(k_in, 4)

    B = 2
    num_classes = 5
    encoder_channels = [8, 16, 32]   # channels of the encoder features (excl. image)

    input_image = jax.random.normal(ks[0], (B, 3, 32, 32), jnp.float32)
    f1 = jax.random.normal(ks[1], (B, 8, 16, 16), jnp.float32)
    f2 = jax.random.normal(ks[2], (B, 16, 8, 8), jnp.float32)
    feat_last = jax.random.normal(ks[3], (B, 32, 4, 4), jnp.float32)

    params = init_params(k_p, num_classes, encoder_channels,
                         fpn_dim=32, ocr_mid=64, ocr_key=64)

    out = upernet_ocr_forward([input_image, f1, f2, feat_last], params)
    out = jax.block_until_ready(out)
    assert out.shape == (B, num_classes, 32, 32), out.shape
    assert bool(jnp.all(jnp.isfinite(out)))
    print("KERNEL_OK")
</pallas_src>

<mosaic_0001>
module attributes {stable_mosaic.version = 11 : i64} {
  func.func @_mm_bias_kernel_single(%arg0: i32, %arg1: memref<32x32xbf16, #tpu.memory_space<vmem>>, %arg2: memref<32x512xbf16, #tpu.memory_space<vmem>>, %arg3: memref<1x512xf32, #tpu.memory_space<vmem>>, %arg4: memref<32x512xbf16, #tpu.memory_space<vmem>>) attributes {dimension_semantics = [#tpu.dimension_semantics<parallel>], iteration_bounds = array<i64: 1>, scalar_prefetch = 0 : i64, scratch_operands = 0 : i64, tpu.core_type = #tpu.core_type<tc>, window_params = [{transform_indices = @transform_0, window_bounds = array<i64: 32, 32>}, {pipeline_mode = #tpu.pipeline_mode<synchronous>, transform_indices = @transform_1, window_bounds = array<i64: 32, 512>}, {pipeline_mode = #tpu.pipeline_mode<synchronous>, transform_indices = @transform_2, window_bounds = array<i64: 1, 512>}, {transform_indices = @transform_3, window_bounds = array<i64: 32, 512>}]} {
    %c0 = arith.constant 0 : index
    %c0_0 = arith.constant 0 : index
    %0 = vector.load %arg1[%c0, %c0_0] : memref<32x32xbf16, #tpu.memory_space<vmem>>, vector<32x32xbf16>
    %c0_1 = arith.constant 0 : index
    %c0_2 = arith.constant 0 : index
    %1 = vector.load %arg2[%c0_1, %c0_2] : memref<32x512xbf16, #tpu.memory_space<vmem>>, vector<32x512xbf16>
    %cst = arith.constant dense<0.000000e+00> : vector<32x512xf32>
    %2 = tpu.matmul %0, %1, %cst {dimension_numbers = #tpu.dot_dimension_numbers<[1], [0], [0], [1], [0, 0, 1, 1], [], []>} : vector<32x32xbf16>, vector<32x512xbf16>, vector<32x512xf32> -> vector<32x512xf32>
    %c0_3 = arith.constant 0 : index
    %c0_4 = arith.constant 0 : index
    %3 = vector.load %arg3[%c0_3, %c0_4] : memref<1x512xf32, #tpu.memory_space<vmem>>, vector<1x512xf32>
    %4 = vector.broadcast %3 : vector<1x512xf32> to vector<32x512xf32>
    %5 = arith.addf %2, %4 : vector<32x512xf32>
    %cst_5 = arith.constant 0.000000e+00 : f32
    %6 = vector.broadcast %cst_5 : f32 to vector<32x512xf32>
    %7 = arith.maximumf %5, %6 : vector<32x512xf32>
    %8 = arith.truncf %7 : vector<32x512xf32> to vector<32x512xbf16>
    %c0_6 = arith.constant 0 : index
    %c0_7 = arith.constant 0 : index
    %9 = vector.load %arg4[%c0_6, %c0_7] : memref<32x512xbf16, #tpu.memory_space<vmem>>, vector<32x512xbf16>
    tpu.vector_store %arg4[%c0_6, %c0_7], %8 {strides = array<i32>} : memref<32x512xbf16, #tpu.memory_space<vmem>>, vector<32x512xbf16>,
    return
  }
  func.func @transform_0(%arg0: i32) -> (i32, i32) {
    %c0_i32 = arith.constant 0 : i32
    %c0_i32_0 = arith.constant 0 : i32
    return %arg0, %c0_i32 : i32, i32
  }
  func.func @transform_1(%arg0: i32) -> (i32, i32) {
    %c0_i32 = arith.constant 0 : i32
    %c0_i32_0 = arith.constant 0 : i32
    %c0_i32_1 = arith.constant 0 : i32
    return %c0_i32, %c0_i32_0 : i32, i32
  }
  func.func @transform_2(%arg0: i32) -> (i32, i32) {
    %c0_i32 = arith.constant 0 : i32
    %c0_i32_0 = arith.constant 0 : i32
    %c0_i32_1 = arith.constant 0 : i32
    return %c0_i32, %c0_i32_0 : i32, i32
  }
  func.func @transform_3(%arg0: i32) -> (i32, i32) {
    %c0_i32 = arith.constant 0 : i32
    %c0_i32_0 = arith.constant 0 : i32
    return %arg0, %c0_i32 : i32, i32
  }
}

</mosaic_0001>

<bundles_post_ra>
// kernel: tpu_custom_call.1
= control target key start
LH: loop header
LB: loop body
LE: loop exit
PB: predicated region body
PF: predicated region fallthrough
CT: control target
= control target key end

     0   :  { %8 = vsyncpa [#allocation3], 0  ;;  %s528_s0 = inlined_call_operand.hbm [shape: bf16[32,32], index: 0, kind: input, shape index: {}]   ;;  %s529_s1 = inlined_call_operand.hbm [shape: bf16[32,512], index: 1, kind: input, shape index: {}]   ;;  %s530_s2 = inlined_call_operand.vmem [shape: f32[1,512], index: 2, kind: input, shape index: {}]   ;;  %s531_s3 = inlined_call_operand.hbm [shape: bf16[32,512], index: 3, kind: output, shape index: {}]  }
   0x1   :  { %9 = vsyncpa [#allocation6], 0 }
   0x2   :  { %10 = vsyncpa [#allocation4], 0  ;;  %s455_s12 = smov [#allocation2]   ;;  %s383_s16 = scalar_lea.hbm %s528_s0, 256 }
   0x3   :  { %s16_s13 = sshll.u32 %s455_s12, 4  ;;  %p384_p0 = scmp.ne.s32.totalorder %s528_s0, %s383_s16  ;;  %s17_s13 = int_to_ptr.vmem [resolvable:$true] %s16_s13 }
   0x4   :  { %p387_p1 = scmp.lt.u32.totalorder %s383_s16, %s528_s0 }
   0x6   :  { %p389_p2 = pnand %p387_p1, %p384_p0 }
   0x8   :  { %392 = shalt.err (!%p389_p2)
}
   0x9   :  { %s393_s21 = scalar_lea.vmem %s17_s13, 256  ;;  %p398_p4 = scmp.lt.s32.totalorder %s17_s13, %s17_s13 }
   0xa   :  { %p394_p3 = scmp.ne.s32.totalorder %s17_s13, %s393_s21  ;;  %p399_p5 = scmp.lt.s32.totalorder %s393_s21, %s393_s21 }
   0xc   :  { %p400_p6 = por %p399_p5, %p398_p4 }
   0xe   :  { %p401_p7 = pnand %p400_p6, %p394_p3 }
  0x10   :  { %404 = shalt.err (!%p401_p7)
}
  0x11   :  { %s456_s22 = smov 64   ;;  %s457_s23 = smov 4  }
  0x12   :  { %22 = dma.hbm_to_vmem [thread:$0]  %s528_s0, 256, %s17_s13, [#allocation3], %s456_s22, %s456_s22, %s457_s23  }
  0x13   :  { %s458_s26 = smov [#allocation5]   ;;  %s405_s30 = scalar_lea.hbm %s529_s1, 1024 }
  0x14   :  { %s28_s27 = sshll.u32 %s458_s26, 4  ;;  %p406_p8 = scmp.ne.s32.totalorder %s529_s1, %s405_s30  ;;  %s29_s27 = int_to_ptr.vmem [resolvable:$true] %s28_s27 }
  0x15   :  { %p409_p9 = scmp.lt.u32.totalorder %s405_s30, %s529_s1 }
  0x17   :  { %p411_p10 = pnand %p409_p9, %p406_p8 }
  0x19   :  { %414 = shalt.err (!%p411_p10)
}
  0x1a   :  { %s415_s8 = scalar_lea.vmem %s29_s27, 1024  ;;  %p420_p12 = scmp.lt.s32.totalorder %s29_s27, %s29_s27 }
  0x1b   :  { %p416_p11 = scmp.ne.s32.totalorder %s29_s27, %s415_s8  ;;  %p421_p13 = scmp.lt.s32.totalorder %s415_s8, %s415_s8 }
  0x1d   :  { %p422_p0 = por %p421_p13, %p420_p12 }
  0x1f   :  { %p423_p1 = pnand %p422_p0, %p416_p11 }
  0x21   :  { %426 = shalt.err (!%p423_p1)
}
  0x22   :  { %s459_s0 = smov 256   ;;  %s460_s9 = smov 16  }
  0x23   :  { %34 = dma.hbm_to_vmem [thread:$0]  %s529_s1, 1024, %s29_s27, [#allocation6], %s459_s0, %s459_s0, %s460_s9  }
  0x24   :  { %449 = dma.done.wait [#allocation3], 256  }
  0x25   :  { %450 = vsyncadd [#allocation3], 4294967040 }
  0x26   :  { %451 = dma.done.wait [#allocation6], 1024  }
  0x27   :  { %452 = vsyncadd [#allocation6], 4294966272  ;;  %v461_v0 = vmov 0   ;;  %v369_v1 = vld [vmem:[#allocation5 + $0x4] ss:$16 sps:$4 sm:$0xff]   ;;  %vm128_vm0 = vcmask 261120   ;;  %v58_v11 = vlaneseq }
  0x28   :  { %167 = vmatprep.mubr.bf16.mxu0 %v461_v0  ;;  %220 = vmatprep.mubr.bf16.mxu1 %v461_v0  ;;  %v371_v2 = vld [vmem:[#allocation5 + $0xc] ss:$16 sps:$4 sm:$0xff]   ;;  %v373_v3 = vld [vmem:[#allocation5] ss:$16 sps:$4 sm:$0xff]   ;;  %v374_v4 = vld [vmem:[#allocation5 + $0x8] ss:$16 sps:$4 sm:$0xff]  }
  0x29   :  { %135 = vmatprep.subr.bf16.mxu0 %v369_v1  ;;  %188 = vmatprep.subr.bf16.mxu1 %v371_v2  ;;  %v375_v5 = vld [vmem:[#allocation5 + $0x24] ss:$16 sps:$4 sm:$0xff]   ;;  %v377_v6 = vld [vmem:[#allocation5 + $0x2c] ss:$16 sps:$4 sm:$0xff]   ;;  %v379_v7 = vld [vmem:[#allocation5 + $0x20] ss:$16 sps:$4 sm:$0xff]  }
  0x2a   :  { %136 = vmatpush1.bf16.msra.mxu0 %v373_v3  ;;  %189 = vmatpush1.bf16.msra.mxu1 %v374_v4  ;;  %v380_v8 = vld [vmem:[#allocation5 + $0x28] ss:$16 sps:$4 sm:$0xff]   ;;  %v381_v9 = vld [vmem:[#allocation2] sm:$0xff]   ;;  %v59_v12 = vshrl.u32 %v58_v11, 7 }
  0x2b   :  { %137 = vmatprep.subr.bf16.mxu0 %v375_v5  ;;  %190 = vmatprep.subr.bf16.mxu1 %v377_v6  ;;  %v382_v10 = vld [vmem:[#allocation2 + $0x8] sm:$0xff]   ;;  %v56_v15 = vld [vmem:[%s530_s2] sm:$0xf]  ;;  %s462_s2 = smov [#allocation7]  }
  0x2c   :  { %v60_v13 = vsub.s32 0, %v59_v12  ;;  %v68_v14 = vsub.s32 2, %v59_v12  ;;  %v64_v16 = vsub.s32 1, %v59_v12  ;;  %v72_v17 = vsub.s32 3, %v59_v12  ;;  %s318_s13 = sshll.u32 %s462_s2, 4  ;;  %s319_s13 = int_to_ptr.vmem [resolvable:$true] %s318_s13 }
  0x2d   :  { %s427_s14 = scalar_lea.vmem %s319_s13, 1024  ;;  %p432_p3 = scmp.lt.s32.totalorder %s319_s13, %s319_s13 }
  0x2e   :  { %138 = vmatpush1.bf16.msra.mxu0 %v379_v7  ;;  %191 = vmatpush1.bf16.msra.mxu1 %v380_v8  ;;  %v61_v18 = vrot.slane %v56_v15, %v60_v13  ;;  %v69_v19 = vrot.slane %v56_v15, %v68_v14  ;;  %v65_v20 = vrot.slane %v56_v15, %v64_v16  ;;  %p428_p2 = scmp.ne.s32.totalorder %s319_s13, %s427_s14  ;;  %p433_p4 = scmp.lt.s32.totalorder %s427_s14, %s427_s14 }
  0x2f   :  { %v73_v21 = vrot.slane %v56_v15, %v72_v17 }
  0x30   :  { %p434_p5 = por %p433_p4, %p432_p3 }
  0x31   :  { %341 = vmatmul.mubr.msk.bf16.vlgmr.msra.gmra.mrb[0].mxu0 %vm128_vm0, %v381_v9  ;;  %343 = vmatmul.mubr.msk.bf16.vlgmr.msra.gmra.mrb[0].mxu1 %vm128_vm0, %v381_v9 }
  0x32   :  { %177 = vmatprep.mubr.bf16.mxu0 %v461_v0  ;;  %230 = vmatprep.mubr.bf16.mxu1 %v461_v0  ;;  %p435_p6 = pnand %p434_p5, %p428_p2 }
  0x39   :  { %342 = vmatmul.mubr.msk.bf16.gmra.mrb[4].mxu0 %vm128_vm0, %v382_v10  ;;  %344 = vmatmul.mubr.msk.bf16.gmra.mrb[4].mxu1 %vm128_vm0, %v382_v10 }
 0x104   :  { %v169_v22 = vpop.f32.mrb[0].mxu0  ;;  %v222_v23 = vpop.f32.mrb[0].mxu1 }
 0x105   :  { %v170_v24 = vadd.f32 %v169_v22, %v61_v18  ;;  %v223_v25 = vadd.f32 %v222_v23, %v69_v19  ;;  %v171_v26 = vpop.f32.mrb[1].mxu0  ;;  %v224_v27 = vpop.f32.mrb[1].mxu1 }
 0x106   :  { %v172_v28 = vadd.f32 %v171_v26, %v65_v20  ;;  %v225_v29 = vadd.f32 %v224_v27, %v73_v21  ;;  %v173_v30 = vpop.f32.mrb[2].mxu0  ;;  %v226_v31 = vpop.f32.mrb[2].mxu1 }
 0x107   :  { %v241_v32 = vmax.f32 %v170_v24, 0.0  ;;  %v243_v33 = vmax.f32 %v223_v25, 0.0  ;;  %v174_v34 = vadd.f32 %v173_v30, %v61_v18  ;;  %v227_v35 = vadd.f32 %v226_v31, %v69_v19  ;;  %v175_v36 = vpop.f32.mrb[3].mxu0  ;;  %v228_v37 = vpop.f32.mrb[3].mxu1 }
 0x108   :  { %v242_v38 = vmax.f32 %v172_v28, 0.0  ;;  %v244_v39 = vmax.f32 %v225_v29, 0.0  ;;  %v176_v40 = vadd.f32 %v175_v36, %v65_v20  ;;  %v229_v41 = vadd.f32 %v228_v37, %v73_v21 }
 0x109   :  { %v245_v42 = vmax.f32 %v174_v34, 0.0  ;;  %v247_v43 = vmax.f32 %v227_v35, 0.0 }
 0x10a   :  { %v353_v44 = vpack.c.bf16 %v242_v38, %v241_v32  ;;  %v354_v45 = vpack.c.bf16 %v244_v39, %v243_v33  ;;  %v246_v46 = vmax.f32 %v176_v40, 0.0  ;;  %v248_v47 = vmax.f32 %v229_v41, 0.0 }
 0x10c   :  { %305 = vst [vmem:[#allocation7] sm:$0xff] %v353_v44  ;;  %306 = vst [vmem:[#allocation7 + $0x8] sm:$0xff] %v354_v45  ;;  %v355_v48 = vpack.c.bf16 %v246_v46, %v245_v42  ;;  %v356_v49 = vpack.c.bf16 %v248_v47, %v247_v43  ;;  %v179_v50 = vpop.f32.mrb[4].mxu0  ;;  %v232_v51 = vpop.f32.mrb[4].mxu1 }
 0x10d   :  { %v180_v52 = vadd.f32 %v179_v50, %v61_v18  ;;  %v233_v53 = vadd.f32 %v232_v51, %v69_v19  ;;  %v181_v54 = vpop.f32.mrb[5].mxu0  ;;  %v234_v55 = vpop.f32.mrb[5].mxu1 }
 0x10e   :  { %307 = vst [vmem:[#allocation7 + $0x10] sm:$0xff] %v355_v48  ;;  %308 = vst [vmem:[#allocation7 + $0x18] sm:$0xff] %v356_v49  ;;  %v182_v56 = vadd.f32 %v181_v54, %v65_v20  ;;  %v235_v57 = vadd.f32 %v234_v55, %v73_v21  ;;  %v183_v58 = vpop.f32.mrb[6].mxu0  ;;  %v236_v59 = vpop.f32.mrb[6].mxu1 }
 0x10f   :  { %v249_v60 = vmax.f32 %v180_v52, 0.0  ;;  %v251_v61 = vmax.f32 %v233_v53, 0.0  ;;  %v184_v62 = vadd.f32 %v183_v58, %v61_v18  ;;  %v237_v63 = vadd.f32 %v236_v59, %v69_v19  ;;  %v185_v0 = vpop.f32.mrb[7].mxu0  ;;  %v238_v1 = vpop.f32.mrb[7].mxu1 }
 0x110   :  { %v250_v2 = vmax.f32 %v182_v56, 0.0  ;;  %v252_v3 = vmax.f32 %v235_v57, 0.0  ;;  %v186_v4 = vadd.f32 %v185_v0, %v65_v20  ;;  %v239_v5 = vadd.f32 %v238_v1, %v73_v21 }
 0x111   :  { %v253_v6 = vmax.f32 %v184_v62, 0.0  ;;  %v255_v7 = vmax.f32 %v237_v63, 0.0 }
 0x112   :  { %v357_v8 = vpack.c.bf16 %v250_v2, %v249_v60  ;;  %v358_v9 = vpack.c.bf16 %v252_v3, %v251_v61  ;;  %v254_v10 = vmax.f32 %v186_v4, 0.0  ;;  %v256_v11 = vmax.f32 %v239_v5, 0.0 }
 0x114   :  { %309 = vst [vmem:[#allocation7 + $0x20] sm:$0xff] %v357_v8  ;;  %310 = vst [vmem:[#allocation7 + $0x28] sm:$0xff] %v358_v9  ;;  %v359_v12 = vpack.c.bf16 %v254_v10, %v253_v6  ;;  %v360_v13 = vpack.c.bf16 %v256_v11, %v255_v7 }
 0x116   :  { %311 = vst [vmem:[#allocation7 + $0x30] sm:$0xff] %v359_v12  ;;  %312 = vst [vmem:[#allocation7 + $0x38] sm:$0xff] %v360_v13 }
 0x117   :  { %438 = shalt.err (!%p435_p6)
}
 0x118   :  { %s439_s17 = scalar_lea.hbm %s531_s3, 1024 }
 0x119   :  { %p440_p7 = scmp.ne.s32.totalorder %s531_s3, %s439_s17  ;;  %p443_p8 = scmp.lt.u32.totalorder %s439_s17, %s531_s3 }
 0x11b   :  { %p445_p9 = pnand %p443_p8, %p440_p7 }
 0x11d   :  { %448 = shalt.err (!%p445_p9)
}
 0x11e   :  { %324 = dma.vmem_to_hbm [thread:$0]  %s319_s13, 1024, %s531_s3, [#allocation4], %s459_s0, %s459_s0, %s460_s9  }
 0x11f   :  { %453 = dma.done.wait [#allocation4], 1024  }
 0x120   :  { %454 = vsyncadd [#allocation4], 4294966272 }
 0x121   :  { %328 = vsyncpa [#allocation3], 1 }
 0x122   :  { %329 = vsyncpa [#allocation6], 1 }
 0x123   :  { %330 = vsyncpa [#allocation4], 1 }

</bundles_post_ra>
